<compile_context>
chip_gen: v5e
topology: v5e:2x2
jax: 0.10.0
libtpu: 0.0.40
codegen_flags: <defaults>
</compile_context>

<pallas_src>
import math

import jax
import jax.numpy as jnp
from jax.experimental import pallas as pl
from jax.experimental.pallas import tpu as pltpu


def prescale_mlp_kernel(x_ref, scale_ref, w1_ref, w2_ref, bias_ref, o_ref):
    PH = w1_ref.shape[1]          # packed hidden width  (P*H)
    PO = w2_ref.shape[1]          # packed output width  (P*O)

    # --- scale_observations, folded to a single FMA (f32 on the VPU) ---
    x = x_ref[...].astype(jnp.float32)          # obs.float()
    inv_rng = scale_ref[0:1, :]                 # [1, P*D], broadcast over rows
    shift = scale_ref[1:2, :]                   # [1, P*D]
    scaled = x * inv_rng - shift                # == where(rng==0, x, (x-min)/rng)

    bias = bias_ref[...]
    b1 = bias[0:1, :PH]
    b2 = bias[1:2, :PO]

    # --- inner model: MLP on the MXU (block-diagonal packed weights),
    #     bf16 operands, f32 accumulation ---
    h = jnp.dot(scaled.astype(w1_ref.dtype), w1_ref[...],
                preferred_element_type=jnp.float32) + b1
    h = jnp.maximum(h, 0.0)
    out = jnp.dot(h.astype(w2_ref.dtype), w2_ref[...],
                  preferred_element_type=jnp.float32) + b2
    o_ref[...] = out.astype(o_ref.dtype)


def _round_up(a, m):
    return ((a + m - 1) // m) * m


def _lcm(a, b):
    return a * b // math.gcd(a, b)


def _pack_factor(D, H, O, max_lanes=4096):
    """Rows packed per lane-dense row: P*D and (ideally) P*O multiples of 128."""
    p_in = 128 // math.gcd(D, 128)     # makes P*D a multiple of 128
    p_out = 128 // math.gcd(O, 128)    # makes P*O a multiple of 128
    for p in (_lcm(p_in, p_out), p_in, 1):
        if p * max(D, H, O) <= max_lanes:
            return p
    return 1


def _block_diag(w, p):
    """(a,b) -> (p*a, p*b) block-diagonal with p copies of w on the diagonal."""
    if p == 1:
        return w
    a, b = w.shape
    eye = jnp.eye(p, dtype=w.dtype)
    return jnp.einsum("pq,ab->paqb", eye, w).reshape(p * a, p * b)


def default_prescaler_redecide(x, min_vals, max_vals, w1, b1, w2, b2,
                               *, tb=8192, param_dtype=jnp.bfloat16,
                               out_dtype=jnp.float32, core_parallel=False):
    B, D = x.shape
    H = w1.shape[1]
    O = w2.shape[1]

    # ---- fold scale_observations into a safe per-feature FMA ----
    min_f = min_vals.reshape(D).astype(jnp.float32)
    max_f = max_vals.reshape(D).astype(jnp.float32)
    rng = max_f - min_f
    zero_rng = rng == 0.0
    inv_rng = jnp.where(zero_rng, 1.0, 1.0 / jnp.where(zero_rng, 1.0, rng))
    shift = jnp.where(zero_rng, 0.0, min_f * inv_rng)

    # ---- lane packing: P original rows per packed (lane-dense) row ----
    P = _pack_factor(D, H, O)
    PD, PH, PO = P * D, P * H, P * O

    scale = jnp.stack([jnp.tile(inv_rng, P), jnp.tile(shift, P)], axis=0)  # [2, PD]

    w1bd = _block_diag(w1.astype(jnp.float32), P).astype(param_dtype)      # [PD, PH]
    w2bd = _block_diag(w2.astype(jnp.float32), P).astype(param_dtype)      # [PH, PO]

    HO = max(PH, PO)
    bias = jnp.zeros((2, HO), jnp.float32)
    bias = bias.at[0, :PH].set(jnp.tile(b1.reshape(H).astype(jnp.float32), P))
    bias = bias.at[1, :PO].set(jnp.tile(b2.reshape(O).astype(jnp.float32), P))

    # Pad batch only up to a multiple of P (<=P-1 rows); packed reshape is contiguous.
    Bp = _round_up(B, P)
    xp = jnp.pad(x, ((0, Bp - B), (0, 0))) if Bp != B else x
    n = Bp // P
    x_pk = xp.reshape(n, PD)

    # ---- batch tiling over packed rows; tail handled as a partial block ----
    tbp_req = max(1, tb // P)
    if tbp_req >= n:
        # keep >=2 grid steps when there is enough work (v7x dual-TC)
        tbp = _round_up((n + 1) // 2, 8) if n >= 16 else n
    else:
        tbp = _round_up(tbp_req, 8)
        if tbp >= n:
            tbp = n
    grid = (pl.cdiv(n, tbp),)

    # ---- exact double-buffered VMEM budget (+ headroom), clamped for v7x ----
    def _padn(v, m):
        return _round_up(max(v, 1), m)

    xi = jnp.dtype(x.dtype).itemsize
    pi = jnp.dtype(param_dtype).itemsize
    oi = jnp.dtype(out_dtype).itemsize
    blk_bytes = (
        _padn(tbp, 8) * _padn(PD, 128) * xi          # x tile
        + _padn(tbp, 8) * _padn(PO, 128) * oi        # out tile
        + _padn(2, 8) * _padn(PD, 128) * 4           # scale
        + _padn(PD, 8) * _padn(PH, 128) * pi         # w1 (block-diag)
        + _padn(PH, 8) * _padn(PO, 128) * pi         # w2 (block-diag)
        + _padn(2, 8) * _padn(HO, 128) * 4           # packed biases
    )
    vmem_limit = int(min(max(2 * blk_bytes + (8 << 20), 32 << 20), 48 << 20))

    sem = pltpu.CORE_PARALLEL if core_parallel else "parallel"

    out_pk = pl.pallas_call(
        prescale_mlp_kernel,
        out_shape=jax.ShapeDtypeStruct((n, PO), out_dtype),
        grid=grid,
        in_specs=[
            pl.BlockSpec((tbp, PD), lambda i: (i, 0)),   # packed x (tiled over batch)
            pl.BlockSpec((2, PD), lambda i: (0, 0)),     # [inv_range; shift] tiled xP
            pl.BlockSpec((PD, PH), lambda i: (0, 0)),    # block-diag w1 (resident)
            pl.BlockSpec((PH, PO), lambda i: (0, 0)),    # block-diag w2 (resident)
            pl.BlockSpec((2, HO), lambda i: (0, 0)),     # [b1; b2] tiled xP
        ],
        out_specs=pl.BlockSpec((tbp, PO), lambda i: (i, 0)),
        compiler_params=pltpu.CompilerParams(
            dimension_semantics=(sem,),
            vmem_limit_bytes=vmem_limit,
        ),
    )(x_pk, scale, w1bd, w2bd, bias)

    out = out_pk.reshape(Bp, O)
    return out[:B] if Bp != B else out


def reference(x, min_vals, max_vals, w1, b1, w2, b2, param_dtype=jnp.bfloat16):
    # PyTorch semantics (divide + where), with the same bf16 matmul-operand
    # rounding as the kernel so the comparison is apples-to-apples.
    x = x.astype(jnp.float32)
    rng = max_vals - min_vals
    scaled = jnp.where(rng == 0.0, x, (x - min_vals) / rng)
    h = jnp.dot(scaled.astype(param_dtype), w1.astype(param_dtype),
                preferred_element_type=jnp.float32) + b1
    h = jnp.maximum(h, 0.0)
    return jnp.dot(h.astype(param_dtype), w2.astype(param_dtype),
                   preferred_element_type=jnp.float32) + b2


if __name__ == "__main__":
    key = jax.random.PRNGKey(0)

    # --- synthetic spaces (mimics setup()) ---
    # observation_space.nvec (len 10, contains a 1 -> exercises the max-min == 0 branch)
    obs_nvec = jnp.array([4, 4, 6, 8, 1, 3, 5, 7, 2, 9], dtype=jnp.float32)
    # action_space.nvec = [3, 3]  ->  len * nvec[0] = 6 action features, max = 2
    act_n = 3
    act_len = 2
    n_obs = obs_nvec.shape[0]
    n_act = act_len * act_n
    D = n_obs + n_act            # 16 total features

    min_vals = jnp.zeros((1, D), dtype=jnp.float32)
    obs_max = obs_nvec - 1.0
    act_max = jnp.ones((n_act,), dtype=jnp.float32) * (act_n - 1)
    max_vals = jnp.concatenate([obs_max, act_max], axis=0).reshape(1, D)

    # --- deterministic inner-model parameters ---
    # B=40 is not a multiple of the pack factor (16) -> exercises the pad+slice path.
    B, H, O = 40, 32, 8
    k1, k2, k3, k4, kx = jax.random.split(key, 5)
    w1 = jax.random.normal(k1, (D, H), dtype=jnp.float32) * 0.1
    b1 = jax.random.normal(k2, (1, H), dtype=jnp.float32) * 0.01
    w2 = jax.random.normal(k3, (H, O), dtype=jnp.float32) * 0.1
    b2 = jax.random.normal(k4, (1, O), dtype=jnp.float32) * 0.01

    # --- deterministic observations (integer-valued, within nvec ranges) ---
    highs = jnp.concatenate([obs_nvec, jnp.full((n_act,), float(act_n))], axis=0)
    u = jax.random.uniform(kx, (B, D), dtype=jnp.float32)
    x = jnp.floor(u * highs).astype(jnp.float32)   # values in [0, nvec-1]

    out = default_prescaler_redecide(x, min_vals, max_vals, w1, b1, w2, b2)
    out = jax.block_until_ready(out)

    ref = reference(x, min_vals, max_vals, w1, b1, w2, b2)
    assert out.shape == (B, O)
    assert jnp.allclose(out, ref, atol=5e-3, rtol=5e-3), "mismatch vs reference"

    print("KERNEL_OK")
</pallas_src>

<mosaic_0001>
module attributes {stable_mosaic.version = 11 : i64} {
  func.func @prescale_mlp_kernel(%arg0: i32, %arg1: memref<3x256xf32, #tpu.memory_space<vmem>>, %arg2: memref<2x256xf32, #tpu.memory_space<vmem>>, %arg3: memref<256x512xbf16, #tpu.memory_space<vmem>>, %arg4: memref<512x128xbf16, #tpu.memory_space<vmem>>, %arg5: memref<2x512xf32, #tpu.memory_space<vmem>>, %arg6: memref<3x128xf32, #tpu.memory_space<vmem>>) attributes {dimension_semantics = [#tpu.dimension_semantics<parallel>], iteration_bounds = array<i64: 1>, scalar_prefetch = 0 : i64, scratch_operands = 0 : i64, tpu.core_type = #tpu.core_type<tc>, window_params = [{transform_indices = @transform_0, window_bounds = array<i64: 3, 256>}, {pipeline_mode = #tpu.pipeline_mode<synchronous>, transform_indices = @transform_1, window_bounds = array<i64: 2, 256>}, {pipeline_mode = #tpu.pipeline_mode<synchronous>, transform_indices = @transform_2, window_bounds = array<i64: 256, 512>}, {pipeline_mode = #tpu.pipeline_mode<synchronous>, transform_indices = @transform_3, window_bounds = array<i64: 512, 128>}, {pipeline_mode = #tpu.pipeline_mode<synchronous>, transform_indices = @transform_4, window_bounds = array<i64: 2, 512>}, {transform_indices = @transform_5, window_bounds = array<i64: 3, 128>}]} {
    %c0 = arith.constant 0 : index
    %c0_0 = arith.constant 0 : index
    %0 = vector.load %arg1[%c0, %c0_0] : memref<3x256xf32, #tpu.memory_space<vmem>>, vector<3x256xf32>
    %c0_1 = arith.constant 0 : index
    %c0_2 = arith.constant 0 : index
    %1 = vector.load %arg2[%c0_1, %c0_2] : memref<2x256xf32, #tpu.memory_space<vmem>>, vector<1x256xf32>
    %c1 = arith.constant 1 : index
    %c0_3 = arith.constant 0 : index
    %2 = vector.load %arg2[%c1, %c0_3] : memref<2x256xf32, #tpu.memory_space<vmem>>, vector<1x256xf32>
    %3 = vector.broadcast %1 : vector<1x256xf32> to vector<3x256xf32>
    %4 = arith.mulf %0, %3 : vector<3x256xf32>
    %5 = vector.broadcast %2 : vector<1x256xf32> to vector<3x256xf32>
    %6 = arith.subf %4, %5 : vector<3x256xf32>
    %c0_4 = arith.constant 0 : index
    %c0_5 = arith.constant 0 : index
    %7 = vector.load %arg5[%c0_4, %c0_5] : memref<2x512xf32, #tpu.memory_space<vmem>>, vector<2x512xf32>
    %8 = vector.extract_strided_slice %7 {offsets = [0, 0], sizes = [1, 512], strides = [1, 1]} : vector<2x512xf32> to vector<1x512xf32>
    %9 = vector.extract_strided_slice %7 {offsets = [1, 0], sizes = [1, 128], strides = [1, 1]} : vector<2x512xf32> to vector<1x128xf32>
    %10 = arith.truncf %6 : vector<3x256xf32> to vector<3x256xbf16>
    %c0_6 = arith.constant 0 : index
    %c0_7 = arith.constant 0 : index
    %11 = vector.load %arg3[%c0_6, %c0_7] : memref<256x512xbf16, #tpu.memory_space<vmem>>, vector<256x512xbf16>
    %cst = arith.constant dense<0.000000e+00> : vector<3x512xf32>
    %12 = tpu.matmul %10, %11, %cst {dimension_numbers = #tpu.dot_dimension_numbers<[1], [0], [0], [1], [0, 0, 1, 1], [], []>} : vector<3x256xbf16>, vector<256x512xbf16>, vector<3x512xf32> -> vector<3x512xf32>
    %13 = vector.broadcast %8 : vector<1x512xf32> to vector<3x512xf32>
    %14 = arith.addf %12, %13 : vector<3x512xf32>
    %cst_8 = arith.constant 0.000000e+00 : f32
    %15 = vector.broadcast %cst_8 : f32 to vector<3x512xf32>
    %16 = arith.maximumf %14, %15 : vector<3x512xf32>
    %17 = arith.truncf %16 : vector<3x512xf32> to vector<3x512xbf16>
    %c0_9 = arith.constant 0 : index
    %c0_10 = arith.constant 0 : index
    %18 = vector.load %arg4[%c0_9, %c0_10] : memref<512x128xbf16, #tpu.memory_space<vmem>>, vector<512x128xbf16>
    %cst_11 = arith.constant dense<0.000000e+00> : vector<3x128xf32>
    %19 = tpu.matmul %17, %18, %cst_11 {dimension_numbers = #tpu.dot_dimension_numbers<[1], [0], [0], [1], [0, 0, 1, 1], [], []>} : vector<3x512xbf16>, vector<512x128xbf16>, vector<3x128xf32> -> vector<3x128xf32>
    %20 = vector.broadcast %9 : vector<1x128xf32> to vector<3x128xf32>
    %21 = arith.addf %19, %20 : vector<3x128xf32>
    %c0_12 = arith.constant 0 : index
    %c0_13 = arith.constant 0 : index
    %22 = vector.load %arg6[%c0_12, %c0_13] : memref<3x128xf32, #tpu.memory_space<vmem>>, vector<3x128xf32>
    tpu.vector_store %arg6[%c0_12, %c0_13], %21 {strides = array<i32>} : memref<3x128xf32, #tpu.memory_space<vmem>>, vector<3x128xf32>,
    return
  }
  func.func @transform_0(%arg0: i32) -> (i32, i32) {
    %c0_i32 = arith.constant 0 : i32
    %c0_i32_0 = arith.constant 0 : i32
    return %arg0, %c0_i32 : i32, i32
  }
  func.func @transform_1(%arg0: i32) -> (i32, i32) {
    %c0_i32 = arith.constant 0 : i32
    %c0_i32_0 = arith.constant 0 : i32
    %c0_i32_1 = arith.constant 0 : i32
    return %c0_i32, %c0_i32_0 : i32, i32
  }
  func.func @transform_2(%arg0: i32) -> (i32, i32) {
    %c0_i32 = arith.constant 0 : i32
    %c0_i32_0 = arith.constant 0 : i32
    %c0_i32_1 = arith.constant 0 : i32
    return %c0_i32, %c0_i32_0 : i32, i32
  }
  func.func @transform_3(%arg0: i32) -> (i32, i32) {
    %c0_i32 = arith.constant 0 : i32
    %c0_i32_0 = arith.constant 0 : i32
    %c0_i32_1 = arith.constant 0 : i32
    return %c0_i32, %c0_i32_0 : i32, i32
  }
  func.func @transform_4(%arg0: i32) -> (i32, i32) {
    %c0_i32 = arith.constant 0 : i32
    %c0_i32_0 = arith.constant 0 : i32
    %c0_i32_1 = arith.constant 0 : i32
    return %c0_i32, %c0_i32_0 : i32, i32
  }
  func.func @transform_5(%arg0: i32) -> (i32, i32) {
    %c0_i32 = arith.constant 0 : i32
    %c0_i32_0 = arith.constant 0 : i32
    return %arg0, %c0_i32 : i32, i32
  }
}

</mosaic_0001>

<bundles_post_ra>
// kernel: tpu_custom_call.1
= control target key start
LH: loop header
LB: loop body
LE: loop exit
PB: predicated region body
PF: predicated region fallthrough
CT: control target
= control target key end

     0   :  { %10 = vsyncpa [#allocation3], 0  ;;  %s1673_s0 = inlined_call_operand.hbm [shape: f32[3,256], index: 0, kind: input, shape index: {}]   ;;  %s1674_s1 = inlined_call_operand.hbm [shape: f32[2,256], index: 1, kind: input, shape index: {}]   ;;  %s1675_s2 = inlined_call_operand.hbm [shape: bf16[256,512], index: 2, kind: input, shape index: {}]   ;;  %s1676_s3 = inlined_call_operand.hbm [shape: bf16[512,128], index: 3, kind: input, shape index: {}]   ;;  %s1677_s4 = inlined_call_operand.hbm [shape: f32[2,512], index: 4, kind: input, shape index: {}]   ;;  %s1678_s5 = inlined_call_operand.hbm [shape: f32[3,128], index: 5, kind: output, shape index: {}]  }
   0x1   :  { %11 = vsyncpa [#allocation6], 0 }
   0x2   :  { %12 = vsyncpa [#allocation9], 0  ;;  %s30_s20 = sshll.u32 %s1674_s1, 4  ;;  %s31_s20 = int_to_ptr.hbm [resolvable:$true] %s30_s20 }
   0x3   :  { %13 = vsyncpa [#allocation4], 0  ;;  %s1601_s21 = smov [#allocation5]   ;;  %s53_s25 = sshll.u32 %s1676_s3, 4  ;;  %s54_s25 = int_to_ptr.hbm [resolvable:$true] %s53_s25 }
   0x4   :  { %s32_s22 = sshll.u32 %s1601_s21, 4  ;;  %s1602_s26 = smov [#allocation8]   ;;  %s33_s22 = int_to_ptr.vmem [resolvable:$true] %s32_s22 }
   0x5   :  { %35 = dma.hbm_to_vmem [thread:$0]  %s31_s20, 64, %s33_s22, [#allocation6]  }
   0x6   :  { %s55_s27 = sshll.u32 %s1602_s26, 4  ;;  %s1603_s28 = smov 64   ;;  %s56_s27 = int_to_ptr.vmem [resolvable:$true] %s55_s27 }
   0x7   :  { %s1604_s29 = smov 4   ;;  %s19_s1 = sshll.u32 %s1673_s0, 4  ;;  %s20_s1 = int_to_ptr.hbm [resolvable:$true] %s19_s1 }
   0x8   :  { %61 = dma.hbm_to_vmem [thread:$0]  %s54_s25, 4096, %s56_s27, [#allocation9], %s1603_s28, %s1603_s28, %s1604_s29  }
   0x9   :  { %s1605_s7 = smov [#allocation2]   ;;  %s40_s3 = sshll.u32 %s1675_s2, 4  ;;  %s41_s3 = int_to_ptr.hbm [resolvable:$true] %s40_s3 }
   0xa   :  { %s21_s8 = sshll.u32 %s1605_s7, 4  ;;  %s1606_s11 = smov [#allocation7]   ;;  %s22_s8 = int_to_ptr.vmem [resolvable:$true] %s21_s8 }
   0xb   :  { %24 = dma.hbm_to_vmem [thread:$0]  %s20_s1, 128, %s22_s8, [#allocation3]  }
   0xc   :  { %s42_s12 = sshll.u32 %s1606_s11, 4  ;;  %s1607_s13 = smov 256   ;;  %s43_s12 = int_to_ptr.vmem [resolvable:$true] %s42_s12 }
   0xd   :  { %s1608_s14 = smov 16   ;;  %s67_s0 = sshll.u32 %s1677_s4, 4  ;;  %s68_s0 = int_to_ptr.hbm [resolvable:$true] %s67_s0 }
   0xe   :  { %48 = dma.hbm_to_vmem [thread:$0]  %s41_s3, 8192, %s43_s12, [#allocation6], %s1607_s13, %s1607_s13, %s1608_s14  }
   0xf   :  { %s1609_s17 = smov [#allocation10]  }
  0x10   :  { %s69_s18 = sshll.u32 %s1609_s17, 4  ;;  %s70_s18 = int_to_ptr.vmem [resolvable:$true] %s69_s18 }
  0x11   :  { %72 = dma.hbm_to_vmem [thread:$0]  %s68_s0, 128, %s70_s18, [#allocation9]  }
  0x12   :  { %1593 = dma.done.wait [#allocation3], 128  }
  0x13   :  { %1594 = vsyncadd [#allocation3], 4294967168 }
  0x14   :  { %1595 = dma.done.wait [#allocation6], 8256  }
  0x15   :  { %1596 = vsyncadd [#allocation6], 4294959040 }
  0x16   :  { %1597 = dma.done.wait [#allocation9], 4224  }
  0x17   :  { %1598 = vsyncadd [#allocation9], 4294963072  ;;  %v1073_v0 = vld [vmem:[#allocation7 + $0xe0] sm:$0xf]  ;;  %v1373_v1 = vld [vmem:[#allocation7 + $0xec] sm:$0xf0] }
  0x18   :  { %v1201_v2 = vld [vmem:[#allocation7 + $0x1e0] sm:$0xf]  ;;  %v1074_v3 = vor.u32 %v1373_v1, %v1073_v0  ;;  %v1405_v4 = vld [vmem:[#allocation7 + $0x1ec] sm:$0xf0]  ;;  %v1371_v5 = vld [vmem:[#allocation7 + $0xe4] sm:$0xf] }
  0x19   :  { %v1075_v6 = vld [vmem:[#allocation7 + $0xf0] sm:$0xf0]  ;;  %v1202_v7 = vor.u32 %v1405_v4, %v1201_v2  ;;  %v1403_v9 = vld [vmem:[#allocation7 + $0x1e4] sm:$0xf]  ;;  %v1057_v11 = vld [vmem:[#allocation7 + $0xc0] sm:$0xf] }
  0x1a   :  { %v1078_v8 = vor.u32 %v1371_v5, %v1075_v6  ;;  %v1203_v10 = vld [vmem:[#allocation7 + $0x1f0] sm:$0xf0]  ;;  %518 = vmatpush.bf16.msra.mxu0 %v1074_v3  ;;  %v1369_v13 = vld [vmem:[#allocation7 + $0xcc] sm:$0xf0]  ;;  %v1185_v14 = vld [vmem:[#allocation7 + $0x1c0] sm:$0xf] }
  0x1b   :  { %v1206_v12 = vor.u32 %v1403_v9, %v1203_v10  ;;  %v1401_v15 = vld [vmem:[#allocation7 + $0x1cc] sm:$0xf0]  ;;  %531 = vmatpush.bf16.msra.mxu1 %v1202_v7  ;;  %v1058_v16 = vor.u32 %v1369_v13, %v1057_v11  ;;  %v1367_v18 = vld [vmem:[#allocation7 + $0xc4] sm:$0xf]  ;;  %v1059_v19 = vld [vmem:[#allocation7 + $0xd0] sm:$0xf0] }
  0x1c   :  { %544 = vmatpush.bf16.msra.mxu2 %v1078_v8  ;;  %v1186_v17 = vor.u32 %v1401_v15, %v1185_v14  ;;  %v1399_v20 = vld [vmem:[#allocation7 + $0x1c4] sm:$0xf]  ;;  %v1062_v21 = vor.u32 %v1367_v18, %v1059_v19  ;;  %v1187_v22 = vld [vmem:[#allocation7 + $0x1d0] sm:$0xf0]  ;;  %v1041_v23 = vld [vmem:[#allocation7 + $0xa0] sm:$0xf] }
  0x1d   :  { %557 = vmatpush.bf16.msra.mxu3 %v1206_v12  ;;  %v1365_v24 = vld [vmem:[#allocation7 + $0xac] sm:$0xf0]  ;;  %v1190_v25 = vor.u32 %v1399_v20, %v1187_v22  ;;  %v1169_v26 = vld [vmem:[#allocation7 + $0x1a0] sm:$0xf]  ;;  %v1363_v28 = vld [vmem:[#allocation7 + $0xa4] sm:$0xf] }
  0x1e   :  { %v1397_v27 = vld [vmem:[#allocation7 + $0x1ac] sm:$0xf0]  ;;  %519 = vmatpush.bf16.msra.mxu0 %v1058_v16  ;;  %v1042_v29 = vor.u32 %v1365_v24, %v1041_v23  ;;  %v1043_v30 = vld [vmem:[#allocation7 + $0xb0] sm:$0xf0]  ;;  %v1395_v31 = vld [vmem:[#allocation7 + $0x1a4] sm:$0xf] }
  0x1f   :  { %v1171_v32 = vld [vmem:[#allocation7 + $0x1b0] sm:$0xf0]  ;;  %532 = vmatpush.bf16.msra.mxu1 %v1186_v17  ;;  %v1170_v33 = vor.u32 %v1397_v27, %v1169_v26  ;;  %v1046_v34 = vor.u32 %v1363_v28, %v1043_v30  ;;  %v1025_v35 = vld [vmem:[#allocation7 + $0x80] sm:$0xf]  ;;  %v1361_v36 = vld [vmem:[#allocation7 + $0x8c] sm:$0xf0] }
  0x20   :  { %545 = vmatpush.bf16.msra.mxu2 %v1062_v21  ;;  %v1153_v37 = vld [vmem:[#allocation7 + $0x180] sm:$0xf]  ;;  %v1174_v38 = vor.u32 %v1395_v31, %v1171_v32  ;;  %v1393_v39 = vld [vmem:[#allocation7 + $0x18c] sm:$0xf0]  ;;  %v1359_v40 = vld [vmem:[#allocation7 + $0x84] sm:$0xf]  ;;  %v1026_v44 = vor.u32 %v1361_v36, %v1025_v35 }
  0x21   :  { %558 = vmatpush.bf16.msra.mxu3 %v1190_v25  ;;  %v1027_v41 = vld [vmem:[#allocation7 + $0x90] sm:$0xf0]  ;;  %v1391_v42 = vld [vmem:[#allocation7 + $0x184] sm:$0xf]  ;;  %v1154_v45 = vor.u32 %v1393_v39, %v1153_v37  ;;  %v1009_v47 = vld [vmem:[#allocation7 + $0x60] sm:$0xf] }
  0x22   :  { %v1155_v43 = vld [vmem:[#allocation7 + $0x190] sm:$0xf0]  ;;  %520 = vmatpush.bf16.msra.mxu0 %v1042_v29  ;;  %v1030_v46 = vor.u32 %v1359_v40, %v1027_v41  ;;  %v1357_v48 = vld [vmem:[#allocation7 + $0x6c] sm:$0xf0]  ;;  %v1137_v49 = vld [vmem:[#allocation7 + $0x160] sm:$0xf] }
  0x23   :  { %533 = vmatpush.bf16.msra.mxu1 %v1170_v33  ;;  %v1158_v50 = vor.u32 %v1391_v42, %v1155_v43  ;;  %v1389_v51 = vld [vmem:[#allocation7 + $0x16c] sm:$0xf0]  ;;  %v1355_v52 = vld [vmem:[#allocation7 + $0x64] sm:$0xf]  ;;  %v1011_v53 = vld [vmem:[#allocation7 + $0x70] sm:$0xf0]  ;;  %v1010_v56 = vor.u32 %v1357_v48, %v1009_v47 }
  0x24   :  { %546 = vmatpush.bf16.msra.mxu2 %v1046_v34  ;;  %v1387_v54 = vld [vmem:[#allocation7 + $0x164] sm:$0xf]  ;;  %v1139_v55 = vld [vmem:[#allocation7 + $0x170] sm:$0xf0]  ;;  %v1138_v57 = vor.u32 %v1389_v51, %v1137_v49  ;;  %v1014_v58 = vor.u32 %v1355_v52, %v1011_v53  ;;  %v993_v59 = vld [vmem:[#allocation7 + $0x40] sm:$0xf] }
  0x25   :  { %559 = vmatpush.bf16.msra.mxu3 %v1174_v38  ;;  %v1353_v60 = vld [vmem:[#allocation7 + $0x4c] sm:$0xf0]  ;;  %v1121_v61 = vld [vmem:[#allocation7 + $0x140] sm:$0xf]  ;;  %v1142_v62 = vor.u32 %v1387_v54, %v1139_v55  ;;  %v1351_v0 = vld [vmem:[#allocation7 + $0x44] sm:$0xf] }
  0x26   :  { %521 = vmatpush.bf16.msra.mxu0 %v1026_v44  ;;  %v1385_v63 = vld [vmem:[#allocation7 + $0x14c] sm:$0xf0]  ;;  %v995_v1 = vld [vmem:[#allocation7 + $0x50] sm:$0xf0]  ;;  %v1383_v2 = vld [vmem:[#allocation7 + $0x144] sm:$0xf]  ;;  %v994_v4 = vor.u32 %v1353_v60, %v993_v59 }
  0x27   :  { %534 = vmatpush.bf16.msra.mxu1 %v1154_v45  ;;  %v1123_v3 = vld [vmem:[#allocation7 + $0x150] sm:$0xf0]  ;;  %v977_v5 = vld [vmem:[#allocation7 + $0x20] sm:$0xf]  ;;  %v1349_v6 = vld [vmem:[#allocation7 + $0x2c] sm:$0xf0]  ;;  %v1122_v7 = vor.u32 %v1385_v63, %v1121_v61  ;;  %v998_v8 = vor.u32 %v1351_v0, %v995_v1 }
  0x28   :  { %547 = vmatpush.bf16.msra.mxu2 %v1030_v46  ;;  %v1105_v9 = vld [vmem:[#allocation7 + $0x120] sm:$0xf]  ;;  %v1381_v10 = vld [vmem:[#allocation7 + $0x12c] sm:$0xf0]  ;;  %v1347_v11 = vld [vmem:[#allocation7 + $0x24] sm:$0xf]  ;;  %v1126_v12 = vor.u32 %v1383_v2, %v1123_v3  ;;  %v978_v19 = vor.u32 %v1349_v6, %v977_v5 }
  0x29   :  { %560 = vmatpush.bf16.msra.mxu3 %v1158_v50  ;;  %v979_v13 = vld [vmem:[#allocation7 + $0x30] sm:$0xf0]  ;;  %v1379_v14 = vld [vmem:[#allocation7 + $0x124] sm:$0xf]  ;;  %v961_v16 = vld [vmem:[#allocation7] sm:$0xf]  ;;  %v1106_v23 = vor.u32 %v1381_v10, %v1105_v9 }
  0x2a   :  { %522 = vmatpush.bf16.msra.mxu0 %v1010_v56  ;;  %v1107_v15 = vld [vmem:[#allocation7 + $0x130] sm:$0xf0]  ;;  %v1345_v17 = vld [vmem:[#allocation7 + $0xc] sm:$0xf0]  ;;  %v1089_v18 = vld [vmem:[#allocation7 + $0x100] sm:$0xf]  ;;  %v982_v24 = vor.u32 %v1347_v11, %v979_v13 }
  0x2b   :  { %535 = vmatpush.bf16.msra.mxu1 %v1138_v57  ;;  %v1377_v20 = vld [vmem:[#allocation7 + $0x10c] sm:$0xf0]  ;;  %v1343_v21 = vld [vmem:[#allocation7 + $0x4] sm:$0xf]  ;;  %v963_v22 = vld [vmem:[#allocation7 + $0x10] sm:$0xf0]  ;;  %v1110_v28 = vor.u32 %v1379_v14, %v1107_v15  ;;  %v962_v35 = vor.u32 %v1345_v17, %v961_v16 }
  0x2c   :  { %548 = vmatpush.bf16.msra.mxu2 %v1014_v58  ;;  %v1375_v25 = vld [vmem:[#allocation7 + $0x104] sm:$0xf]  ;;  %v1091_v26 = vld [vmem:[#allocation7 + $0x110] sm:$0xf0]  ;;  %v1081_v27 = vld [vmem:[#allocation7 + $0xe8] sm:$0xf]  ;;  %v1090_v36 = vor.u32 %v1377_v20, %v1089_v18  ;;  %v966_v37 = vor.u32 %v1343_v21, %v963_v22 }
  0x2d   :  { %561 = vmatpush.bf16.msra.mxu3 %v1142_v62  ;;  %v1374_v29 = vld [vmem:[#allocation7 + $0xf4] sm:$0xf0]  ;;  %v1209_v30 = vld [vmem:[#allocation7 + $0x1e8] sm:$0xf]  ;;  %v1372_v32 = vld [vmem:[#allocation7 + $0xec] sm:$0xf]  ;;  %v1094_v45 = vor.u32 %v1375_v25, %v1091_v26 }
  0x2e   :  { %523 = vmatpush.bf16.msra.mxu0 %v994_v4  ;;  %v1406_v31 = vld [vmem:[#allocation7 + $0x1f4] sm:$0xf0]  ;;  %v1083_v33 = vld [vmem:[#allocation7 + $0xf8] sm:$0xf0]  ;;  %v1404_v34 = vld [vmem:[#allocation7 + $0x1ec] sm:$0xf]  ;;  %v1082_v46 = vor.u32 %v1374_v29, %v1081_v27 }
  0x2f   :  { %536 = vmatpush.bf16.msra.mxu1 %v1122_v7  ;;  %v94_v38 = vld [vmem:[#allocation5] ss:$2 sm:$0x3]  ;;  %v96_v39 = vld [vmem:[#allocation5 + $0x1] ss:$2 sm:$0x3]  ;;  %v1210_v49 = vor.u32 %v1406_v31, %v1209_v30  ;;  %v1086_v50 = vor.u32 %v1372_v32, %v1083_v33 }
  0x30   :  { %549 = vmatpush.bf16.msra.mxu2 %v998_v8  ;;  %v1211_v40 = vld [vmem:[#allocation7 + $0x1f8] sm:$0xf0]  ;;  %v98_v41 = vperm.slane %v94_v38, 0  ;;  %v99_v42 = vperm.slane %v94_v38, 1  ;;  %v106_v43 = vperm.slane %v96_v39, 0  ;;  %v107_v44 = vperm.slane %v96_v39, 1 }
  0x31   :  { %562 = vmatpush.bf16.msra.mxu3 %v1126_v12  ;;  %v1065_v47 = vld [vmem:[#allocation7 + $0xc8] sm:$0xf]  ;;  %v1370_v48 = vld [vmem:[#allocation7 + $0xd4] sm:$0xf0]  ;;  %vm101_vm0 = vcmask 1043456   ;;  %v1214_v55 = vor.u32 %v1404_v34, %v1211_v40  ;;  %s1610_s2 = smov [#allocation11]  }
  0x32   :  { %524 = vmatpush.bf16.msra.mxu0 %v978_v19  ;;  %v1193_v51 = vld [vmem:[#allocation7 + $0x1c8] sm:$0xf]  ;;  %v93_v52 = vld [vmem:[#allocation2] sm:$0x77]  ;;  %v100_v53 = vrot.slane %v99_v42, 4  ;;  %v108_v54 = vrot.slane %v107_v44, 4  ;;  %v1066_v63 = vor.u32 %v1370_v48, %v1065_v47 }
  0x33   :  { %537 = vmatpush.bf16.msra.mxu1 %v1106_v23  ;;  %v1402_v56 = vld [vmem:[#allocation7 + $0x1d4] sm:$0xf0]  ;;  %v1368_v57 = vld [vmem:[#allocation7 + $0xcc] sm:$0xf]  ;;  %v1067_v58 = vld [vmem:[#allocation7 + $0xd8] sm:$0xf0] }
  0x34   :  { %550 = vmatpush.bf16.msra.mxu2 %v982_v24  ;;  %v1400_v59 = vld [vmem:[#allocation7 + $0x1cc] sm:$0xf]  ;;  %v1195_v60 = vld [vmem:[#allocation7 + $0x1d8] sm:$0xf0]  ;;  %v102_v61 = vsel %vm101_vm0, %v98_v41, %v100_v53  ;;  %v109_v62 = vsel %vm101_vm0, %v106_v43, %v108_v54  ;;  %v1194_v1 = vor.u32 %v1402_v56, %v1193_v51  ;;  %v1070_v2 = vor.u32 %v1368_v57, %v1067_v58  ;;  %v1049_v3 = vld [vmem:[#allocation7 + $0xa8] sm:$0xf] }
  0x35   :  { %563 = vmatpush.bf16.msra.mxu3 %v1110_v28  ;;  %v104_v0 = vmul.f32 %v102_v61, %v93_v52  ;;  %v1366_v4 = vld [vmem:[#allocation7 + $0xb4] sm:$0xf0]  ;;  %v1177_v5 = vld [vmem:[#allocation7 + $0x1a8] sm:$0xf]  ;;  %v1198_v6 = vor.u32 %v1400_v59, %v1195_v60  ;;  %v1364_v9 = vld [vmem:[#allocation7 + $0xac] sm:$0xf] }
  0x36   :  { %525 = vmatpush.bf16.msra.mxu0 %v962_v35  ;;  %v1398_v8 = vld [vmem:[#allocation7 + $0x1b4] sm:$0xf0]  ;;  %v1051_v10 = vld [vmem:[#allocation7 + $0xb8] sm:$0xf0]  ;;  %v1396_v11 = vld [vmem:[#allocation7 + $0x1ac] sm:$0xf]  ;;  %v1050_v13 = vor.u32 %v1366_v4, %v1049_v3 }
  0x37   :  { %538 = vmatpush.bf16.msra.mxu1 %v1090_v36  ;;  %v111_v7 = vsub.f32 %v104_v0, %v109_v62  ;;  %v1179_v12 = vld [vmem:[#allocation7 + $0x1b8] sm:$0xf0]  ;;  %v1178_v14 = vor.u32 %v1398_v8, %v1177_v5  ;;  %v1054_v15 = vor.u32 %v1364_v9, %v1051_v10  ;;  %v1033_v16 = vld [vmem:[#allocation7 + $0x88] sm:$0xf]  ;;  %v1362_v17 = vld [vmem:[#allocation7 + $0x94] sm:$0xf0] }
  0x38   :  { %551 = vmatpush.bf16.msra.mxu2 %v966_v37  ;;  %v1161_v18 = vld [vmem:[#allocation7 + $0x188] sm:$0xf]  ;;  %v1182_v19 = vor.u32 %v1396_v11, %v1179_v12  ;;  %v1394_v20 = vld [vmem:[#allocation7 + $0x194] sm:$0xf0]  ;;  %v1360_v21 = vld [vmem:[#allocation7 + $0x8c] sm:$0xf]  ;;  %v1034_v23 = vor.u32 %v1362_v17, %v1033_v16 }
  0x39   :  { %564 = vmatpush.bf16.msra.mxu3 %v1094_v45  ;;  %114 = vst [vmem:[#allocation1] ss:$2 sm:$0xff] %v111_v7  ;;  %v1035_v22 = vld [vmem:[#allocation7 + $0x98] sm:$0xf0]  ;;  %v1392_v24 = vld [vmem:[#allocation7 + $0x18c] sm:$0xf]  ;;  %v1162_v26 = vor.u32 %v1394_v20, %v1161_v18 }
  0x3a   :  { %570 = vmatpush.bf16.msrb.mxu0 %v1082_v46  ;;  %v1163_v25 = vld [vmem:[#allocation7 + $0x198] sm:$0xf0]  ;;  %v1038_v27 = vor.u32 %v1360_v21, %v1035_v22  ;;  %v1017_v28 = vld [vmem:[#allocation7 + $0x68] sm:$0xf]  ;;  %v1358_v29 = vld [vmem:[#allocation7 + $0x74] sm:$0xf0] }
  0x3b   :  { %583 = vmatpush.bf16.msrb.mxu1 %v1210_v49  ;;  %v1145_v30 = vld [vmem:[#allocation7 + $0x168] sm:$0xf]  ;;  %v1390_v31 = vld [vmem:[#allocation7 + $0x174] sm:$0xf0]  ;;  %v1356_v32 = vld [vmem:[#allocation7 + $0x6c] sm:$0xf]  ;;  %v1166_v36 = vor.u32 %v1392_v24, %v1163_v25  ;;  %v1018_v39 = vor.u32 %v1358_v29, %v1017_v28 }
  0x3c   :  { %596 = vmatpush.bf16.msrb.mxu2 %v1086_v50  ;;  %v1019_v33 = vld [vmem:[#allocation7 + $0x78] sm:$0xf0]  ;;  %v1388_v40 = vld [vmem:[#allocation7 + $0x16c] sm:$0xf]  ;;  %v1146_v42 = vor.u32 %v1390_v31, %v1145_v30  ;;  %v1001_v44 = vld [vmem:[#allocation7 + $0x48] sm:$0xf] }
  0x3d   :  { %609 = vmatpush.bf16.msrb.mxu3 %v1214_v55  ;;  %v1147_v41 = vld [vmem:[#allocation7 + $0x178] sm:$0xf0]  ;;  %v1022_v43 = vor.u32 %v1356_v32, %v1019_v33  ;;  %v1354_v45 = vld [vmem:[#allocation7 + $0x54] sm:$0xf0]  ;;  %v1129_v46 = vld [vmem:[#allocation7 + $0x148] sm:$0xf] }
  0x3e   :  { %571 = vmatpush.bf16.msrb.mxu0 %v1066_v63  ;;  %v1386_v47 = vld [vmem:[#allocation7 + $0x154] sm:$0xf0]  ;;  %v1352_v48 = vld [vmem:[#allocation7 + $0x4c] sm:$0xf]  ;;  %v1003_v49 = vld [vmem:[#allocation7 + $0x58] sm:$0xf0]  ;;  %v1150_v50 = vor.u32 %v1388_v40, %v1147_v41  ;;  %v1002_v51 = vor.u32 %v1354_v45, %v1001_v44 }
  0x3f   :  { %584 = vmatpush.bf16.msrb.mxu1 %v1194_v1  ;;  %v1384_v52 = vld [vmem:[#allocation7 + $0x14c] sm:$0xf]  ;;  %v1131_v53 = vld [vmem:[#allocation7 + $0x158] sm:$0xf0]  ;;  %v1130_v54 = vor.u32 %v1386_v47, %v1129_v46  ;;  %v1006_v55 = vor.u32 %v1352_v48, %v1003_v49  ;;  %v985_v56 = vld [vmem:[#allocation7 + $0x28] sm:$0xf] }
  0x40   :  { %597 = vmatpush.bf16.msrb.mxu2 %v1070_v2  ;;  %v115_v34 = vld.sshfl [vmem:[#allocation1] sm:$0xff pattern:$0x75316420]  ;;  %v116_v35 = vld.sshfl [vmem:[#allocation1 + $0x8] sm:$0xff pattern:$0x75316420]  ;;  %v1134_v62 = vor.u32 %v1384_v52, %v1131_v53 }
  0x41   :  { %610 = vmatpush.bf16.msrb.mxu3 %v1198_v6  ;;  %v1658_v37 = vpack.c.bf16 %v115_v34, %v115_v34  ;;  %v1660_v38 = vpack.c.bf16 %v116_v35, %v116_v35  ;;  %v1350_v57 = vld [vmem:[#allocation7 + $0x34] sm:$0xf0]  ;;  %v1113_v58 = vld [vmem:[#allocation7 + $0x128] sm:$0xf]  ;;  %v1348_v60 = vld [vmem:[#allocation7 + $0x2c] sm:$0xf] }
  0x42   :  { %572 = vmatpush.bf16.msrb.mxu0 %v1050_v13  ;;  %v1382_v59 = vld [vmem:[#allocation7 + $0x134] sm:$0xf0]  ;;  %v987_v61 = vld [vmem:[#allocation7 + $0x38] sm:$0xf0]  ;;  %v986_v63 = vor.u32 %v1350_v57, %v985_v56  ;;  %v1380_v0 = vld [vmem:[#allocation7 + $0x12c] sm:$0xf] }
  0x43   :  { %585 = vmatpush.bf16.msrb.mxu1 %v1178_v14  ;;  %552 = vmatmul.bf16.vlgmr.msra.gmra.mxu2 %v1658_v37  ;;  %v1115_v1 = vld [vmem:[#allocation7 + $0x138] sm:$0xf0]  ;;  %v1114_v2 = vor.u32 %v1382_v59, %v1113_v58  ;;  %v990_v3 = vor.u32 %v1348_v60, %v987_v61  ;;  %v969_v4 = vld [vmem:[#allocation7 + $0x8] sm:$0xf]  ;;  %v1346_v5 = vld [vmem:[#allocation7 + $0x14] sm:$0xf0] }
  0x44   :  { %598 = vmatpush.bf16.msrb.mxu2 %v1054_v15  ;;  %565 = vmatmul.bf16.vlgmr.msra.gmra.mxu3 %v1660_v38  ;;  %v1097_v6 = vld [vmem:[#allocation7 + $0x108] sm:$0xf]  ;;  %v1378_v7 = vld [vmem:[#allocation7 + $0x114] sm:$0xf0]  ;;  %v1344_v8 = vld [vmem:[#allocation7 + $0xc] sm:$0xf]  ;;  %v1118_v10 = vor.u32 %v1380_v0, %v1115_v1  ;;  %v970_v11 = vor.u32 %v1346_v5, %v969_v4 }
  0x45   :  { %611 = vmatpush.bf16.msrb.mxu3 %v1182_v19  ;;  %526 = vmatmul.bf16.vlgmr.msra.gmra.mxu0 %v1658_v37  ;;  %v971_v9 = vld [vmem:[#allocation7 + $0x18] sm:$0xf0]  ;;  %v1376_v12 = vld [vmem:[#allocation7 + $0x10c] sm:$0xf]  ;;  %v1098_v14 = vor.u32 %v1378_v7, %v1097_v6  ;;  %v1413_v20 = vld [vmem:[#allocation8 + $0x30] sm:$0xff]  ;;  %s945_s4 = sshll.u32 %s1610_s2, 4  ;;  %s946_s4 = int_to_ptr.vmem [resolvable:$true] %s945_s4 }
  0x46   :  { %573 = vmatpush.bf16.msrb.mxu0 %v1034_v23  ;;  %539 = vmatmul.bf16.vlgmr.msra.gmra.mxu1 %v1660_v38  ;;  %v1099_v13 = vld [vmem:[#allocation7 + $0x118] sm:$0xf0]  ;;  %v974_v15 = vor.u32 %v1344_v8, %v971_v9  ;;  %v1421_v21 = vld [vmem:[#allocation8 + $0x70] sm:$0xff]  ;;  %v1412_v22 = vld [vmem:[#allocation8 + $0x28] sm:$0xff]  ;;  %s947_s21 = sshll.u32 %s1678_s5, 4  ;;  %s948_s21 = int_to_ptr.hbm [resolvable:$true] %s947_s21 }
  0x47   :  { %586 = vmatpush.bf16.msrb.mxu1 %v1162_v26  ;;  %v1414_v16 = vld [vmem:[#allocation8 + $0x38] sm:$0xff]  ;;  %v1102_v18 = vor.u32 %v1376_v12, %v1099_v13  ;;  %v1420_v23 = vld [vmem:[#allocation8 + $0x68] sm:$0xff]  ;;  %v1411_v24 = vld [vmem:[#allocation8 + $0x20] sm:$0xff] }
  0x48   :  { %599 = vmatpush.bf16.msrb.mxu2 %v1038_v27  ;;  %v1422_v17 = vld [vmem:[#allocation8 + $0x78] sm:$0xff]  ;;  %v1419_v25 = vld [vmem:[#allocation8 + $0x60] sm:$0xff]  ;;  %v1409_v28 = vld [vmem:[#allocation8 + $0x10] sm:$0xff] }
  0x49   :  { %612 = vmatpush.bf16.msrb.mxu3 %v1166_v36  ;;  %v1430_v19 = vld [vmem:[#allocation8 + $0xb8] sm:$0xff]  ;;  %v1417_v29 = vld [vmem:[#allocation8 + $0x50] sm:$0xff]  ;;  %v1408_v31 = vld [vmem:[#allocation8 + $0x8] sm:$0xff] }
  0x4a   :  { %574 = vmatpush.bf16.msrb.mxu0 %v1018_v39  ;;  %v1410_v26 = vld [vmem:[#allocation8 + $0x18] sm:$0xff]  ;;  %v1429_v30 = vld [vmem:[#allocation8 + $0xb0] sm:$0xff]  ;;  %v1416_v32 = vld [vmem:[#allocation8 + $0x48] sm:$0xff] }
  0x4b   :  { %587 = vmatpush.bf16.msrb.mxu1 %v1146_v42  ;;  %v1418_v27 = vld [vmem:[#allocation8 + $0x58] sm:$0xff]  ;;  %v1428_v34 = vld [vmem:[#allocation8 + $0xa8] sm:$0xff]  ;;  %v1407_v35 = vld [vmem:[#allocation8] sm:$0xff] }
  0x4c   :  { %600 = vmatpush.bf16.msrb.mxu2 %v1022_v43  ;;  %v1438_v33 = vld [vmem:[#allocation8 + $0xf8] sm:$0xff]  ;;  %v1415_v36 = vld [vmem:[#allocation8 + $0x40] sm:$0xff]  ;;  %v1436_v39 = vld [vmem:[#allocation8 + $0xe8] sm:$0xff] }
  0x4d   :  { %613 = vmatpush.bf16.msrb.mxu3 %v1150_v50  ;;  %v1426_v40 = vld [vmem:[#allocation8 + $0x98] sm:$0xff]  ;;  %v1435_v41 = vld [vmem:[#allocation8 + $0xe0] sm:$0xff]  ;;  %v1425_v42 = vld [vmem:[#allocation8 + $0x90] sm:$0xff] }
  0x4e   :  { %575 = vmatpush.bf16.msrb.mxu0 %v1002_v51  ;;  %v1434_v43 = vld [vmem:[#allocation8 + $0xd8] sm:$0xff]  ;;  %v112_v44 = vld [vmem:[#allocation10] sm:$0xff]  ;;  %v1424_v45 = vld [vmem:[#allocation8 + $0x88] sm:$0xff] }
  0x4f   :  { %588 = vmatpush.bf16.msrb.mxu1 %v1130_v54  ;;  %v1433_v46 = vld [vmem:[#allocation8 + $0xd0] sm:$0xff]  ;;  %v186_v47 = vperm.slane %v112_v44, 0  ;;  %v1423_v48 = vld [vmem:[#allocation8 + $0x80] sm:$0xff]  ;;  %v1432_v50 = vld [vmem:[#allocation8 + $0xc8] sm:$0xff]  ;;  %v187_v51 = vperm.slane %v112_v44, 2  ;;  %v189_v9 = vperm.slane %v112_v44, 6 }
  0x50   :  { %601 = vmatpush.bf16.msrb.mxu2 %v1006_v55  ;;  %v1431_v53 = vld [vmem:[#allocation8 + $0xc0] sm:$0xff] }
  0x51   :  { %614 = vmatpush.bf16.msrb.mxu3 %v1134_v62  ;;  %v194_v49 = vperm.slane %v186_v47, 0  ;;  %v195_v56 = vperm.slane %v187_v51, 0  ;;  %v197_v13 = vperm.slane %v189_v9, 0 }
  0x52   :  { %576 = vmatpush.bf16.msrb.mxu0 %v986_v63 }
  0x53   :  { %589 = vmatpush.bf16.msrb.mxu1 %v1114_v2  ;;  %v188_v2 = vperm.slane %v112_v44, 4 }
  0x54   :  { %602 = vmatpush.bf16.msrb.mxu2 %v990_v3 }
  0x55   :  { %615 = vmatpush.bf16.msrb.mxu3 %v1118_v10  ;;  %v196_v7 = vperm.slane %v188_v2, 0 }
  0x56   :  { %577 = vmatpush.bf16.msrb.mxu0 %v970_v11 }
  0x57   :  { %590 = vmatpush.bf16.msrb.mxu1 %v1098_v14 }
  0x58   :  { %603 = vmatpush.bf16.msrb.mxu2 %v974_v15 }
  0x59   :  { %616 = vmatpush.bf16.msrb.mxu3 %v1102_v18  ;;  %578 = vmatmul.bf16.vlgmr.msrb.gmra.mxu0 %v1658_v37 }
  0x5a   :  { %887 = vmatpush.bf16.msra.mxu0 %v1414_v16  ;;  %591 = vmatmul.bf16.vlgmr.msrb.gmra.mxu1 %v1660_v38 }
  0x5b   :  { %900 = vmatpush.bf16.msra.mxu1 %v1422_v17  ;;  %604 = vmatmul.bf16.vlgmr.msrb.gmra.mxu2 %v1658_v37  ;;  %v1437_v37 = vld [vmem:[#allocation8 + $0xf0] sm:$0xff] }
  0x5c   :  { %913 = vmatpush.bf16.msra.mxu2 %v1430_v19  ;;  %617 = vmatmul.bf16.vlgmr.msrb.gmra.mxu3 %v1660_v38  ;;  %v1427_v38 = vld [vmem:[#allocation8 + $0xa0] sm:$0xff] }
  0x5d   :  { %926 = vmatpush.bf16.msra.mxu3 %v1438_v33 }
  0x5e   :  { %888 = vmatpush.bf16.msra.mxu0 %v1413_v20 }
  0x5f   :  { %901 = vmatpush.bf16.msra.mxu1 %v1421_v21 }
  0x60   :  { %914 = vmatpush.bf16.msra.mxu2 %v1429_v30  ;;  %v694_v30 = vperm.slane %v112_v44, 1 }
  0x61   :  { %927 = vmatpush.bf16.msra.mxu3 %v1437_v37 }
  0x62   :  { %889 = vmatpush.bf16.msra.mxu0 %v1412_v22 }
  0x63   :  { %902 = vmatpush.bf16.msra.mxu1 %v1420_v23 }
  0x64   :  { %915 = vmatpush.bf16.msra.mxu2 %v1428_v34 }
  0x65   :  { %928 = vmatpush.bf16.msra.mxu3 %v1436_v39 }
  0x66   :  { %890 = vmatpush.bf16.msra.mxu0 %v1411_v24 }
  0x67   :  { %903 = vmatpush.bf16.msra.mxu1 %v1419_v25 }
  0x68   :  { %916 = vmatpush.bf16.msra.mxu2 %v1427_v38 }
  0x69   :  { %929 = vmatpush.bf16.msra.mxu3 %v1435_v41 }
  0x6a   :  { %891 = vmatpush.bf16.msra.mxu0 %v1410_v26 }
  0x6b   :  { %904 = vmatpush.bf16.msra.mxu1 %v1418_v27 }
  0x6c   :  { %917 = vmatpush.bf16.msra.mxu2 %v1426_v40 }
  0x6d   :  { %930 = vmatpush.bf16.msra.mxu3 %v1434_v43 }
  0x6e   :  { %892 = vmatpush.bf16.msra.mxu0 %v1409_v28 }
  0x6f   :  { %905 = vmatpush.bf16.msra.mxu1 %v1417_v29 }
  0x70   :  { %918 = vmatpush.bf16.msra.mxu2 %v1425_v42 }
  0x71   :  { %931 = vmatpush.bf16.msra.mxu3 %v1433_v46 }
  0x72   :  { %893 = vmatpush.bf16.msra.mxu0 %v1408_v31 }
  0x73   :  { %906 = vmatpush.bf16.msra.mxu1 %v1416_v32 }
  0x74   :  { %919 = vmatpush.bf16.msra.mxu2 %v1424_v45 }
  0x75   :  { %932 = vmatpush.bf16.msra.mxu3 %v1432_v50 }
  0x76   :  { %894 = vmatpush.bf16.msra.mxu0 %v1407_v35 }
  0x77   :  { %907 = vmatpush.bf16.msra.mxu1 %v1415_v36 }
  0x78   :  { %920 = vmatpush.bf16.msra.mxu2 %v1423_v48 }
  0x79   :  { %933 = vmatpush.bf16.msra.mxu3 %v1431_v53 }
  0xc2   :  { %v527_v52 = vpop.f32.mrf.mxu0 }
  0xc3   :  { %v528_v54 = vadd.f32 %v527_v52, %v194_v49  ;;  %v540_v55 = vpop.f32.mrf.mxu1 }
  0xc5   :  { %v541_v57 = vadd.f32 %v540_v55, %v528_v54 }
  0xc6   :  { %v553_v58 = vpop.f32.mrf.mxu2 }
  0xc7   :  { %v622_v59 = vmax.f32 %v541_v57, 0.0  ;;  %v566_v60 = vpop.f32.mrf.mxu3  ;;  %v554_v61 = vadd.f32 %v553_v58, %v195_v56 }
  0xc9   :  { %v626_v62 = vpack.c.bf16 %v622_v59, %v622_v59  ;;  %v567_v63 = vadd.f32 %v566_v60, %v554_v61 }
  0xca   :  { %v529_v0 = vpop.f32.mrf.mxu0 }
  0xcb   :  { %895 = vmatmul.bf16.vlgmr.msra.gmra.mxu0 %v626_v62  ;;  %v542_v1 = vpop.f32.mrf.mxu1  ;;  %v623_v3 = vmax.f32 %v567_v63, 0.0 }
  0xcd   :  { %v627_v4 = vpack.c.bf16 %v623_v3, %v623_v3 }
  0xce   :  { %v555_v5 = vpop.f32.mrf.mxu2 }
  0xcf   :  { %v568_v6 = vpop.f32.mrf.mxu3  ;;  %908 = vmatmul.bf16.vlgmr.msra.gmra.mxu1 %v627_v4 }
  0xd6   :  { %v579_v8 = vpop.f32.mrf.mxu0 }
  0xd7   :  { %v580_v10 = vadd.f32 %v579_v8, %v196_v7  ;;  %v592_v11 = vpop.f32.mrf.mxu1 }
  0xd9   :  { %v593_v12 = vadd.f32 %v592_v11, %v580_v10 }
  0xdb   :  { %v624_v14 = vmax.f32 %v593_v12, 0.0 }
  0xdd   :  { %v628_v15 = vpack.c.bf16 %v624_v14, %v624_v14 }
  0xde   :  { %v605_v16 = vpop.f32.mrf.mxu2  ;;  %v581_v18 = vpop.f32.mrf.mxu0 }
  0xdf   :  { %v606_v17 = vadd.f32 %v605_v16, %v197_v13  ;;  %v618_v19 = vpop.f32.mrf.mxu3  ;;  %v594_v20 = vpop.f32.mrf.mxu1  ;;  %921 = vmatmul.bf16.vlgmr.msra.gmra.mxu2 %v628_v15 }
  0xe1   :  { %v619_v21 = vadd.f32 %v618_v19, %v606_v17 }
  0xe3   :  { %v625_v22 = vmax.f32 %v619_v21, 0.0 }
  0xe5   :  { %v629_v23 = vpack.c.bf16 %v625_v22, %v625_v22 }
  0xe6   :  { %v607_v24 = vpop.f32.mrf.mxu2 }
  0xe7   :  { %934 = vmatmul.bf16.vlgmr.msra.gmra.mxu3 %v629_v23  ;;  %v620_v25 = vpop.f32.mrf.mxu3 }
 0x148   :  { %v896_v26 = vpop.f32.mrf.mxu0 }
 0x149   :  { %v897_v31 = vadd.f32 %v896_v26, %v694_v30 }
 0x14c   :  { %v909_v27 = vpop.f32.mrf.mxu1 }
 0x14d   :  { %v910_v33 = vadd.f32 %v909_v27, %v897_v31 }
 0x150   :  { %v898_v28 = vpop.f32.mrf.mxu0 }
 0x154   :  { %v911_v29 = vpop.f32.mrf.mxu1 }
 0x162   :  { %v922_v32 = vpop.f32.mrf.mxu2 }
 0x163   :  { %v923_v34 = vadd.f32 %v922_v32, %v910_v33 }
 0x16a   :  { %v935_v35 = vpop.f32.mrf.mxu3  ;;  %v924_v37 = vpop.f32.mrf.mxu2 }
 0x16b   :  { %v936_v36 = vadd.f32 %v935_v35, %v923_v34 }
 0x16d   :  { %939 = vst [vmem:[#allocation11] sm:$0x7] %v936_v36 }
 0x16e   :  { %950 = dma.vmem_to_hbm [thread:$0]  %s946_s4, 64, %s948_s21, [#allocation4]  }
 0x172   :  { %v937_v38 = vpop.f32.mrf.mxu3 }
 0x173   :  { %1599 = dma.done.wait [#allocation4], 64  }
 0x174   :  { %1600 = vsyncadd [#allocation4], 4294967232 }
 0x175   :  { %955 = vsyncpa [#allocation3], 1 }
 0x176   :  { %956 = vsyncpa [#allocation6], 1 }
 0x177   :  { %957 = vsyncpa [#allocation9], 1 }
 0x178   :  { %958 = vsyncpa [#allocation4], 1 }

</bundles_post_ra>
